<compile_context>
chip_gen: v7x
topology: tpu7x:2x2x1
jax: 0.10.0
libtpu: 0.0.40
codegen_flags: <defaults>
</compile_context>

<pallas_src>
import functools

import jax
import jax.numpy as jnp
from jax.experimental import pallas as pl
from jax.experimental.pallas import tpu as pltpu


# ------------------------------ VMEM budgeting --------------------------------

def _vmem_limits():
    """(scoped vmem_limit_bytes, block budget) derived from the actual device."""
    try:
        cap = int(pltpu.get_tpu_info().vmem_capacity_bytes)
    except Exception:  # no device / old jax: assume the smallest (v7x, 64 MiB)
        cap = 64 << 20
    limit = min(cap // 2, 64 << 20)       # v5e/v6e -> 64 MiB, v7x -> 32 MiB
    budget = (limit * 3) // 4             # headroom for weights/attn/pipeline
    return limit, budget


def _pick_spatial_tile(hw_pad, n_streams, c, itemsize, budget_bytes):
    """Largest lane-aligned divisor tile of hw_pad whose per-step VMEM fits.

    Per-step footprint ~= 2 * n_streams * c * t * itemsize (double-buffered
    input/output blocks of the widest kernel) + c * t * 4 (lane-wide f32
    accumulator scratch in the reduction kernel).
    """
    for t in (8192, 4096, 2048, 1024, 512, 256, 128):
        if t <= hw_pad and hw_pad % t == 0:
            if (2 * n_streams * c * t * itemsize + c * t * 4) <= budget_bytes:
                return t
    return 128


# ------------------------- kernel 1: GAP + MLP + softmax ----------------------

def _sk_attn_kernel(*refs, n_branch, c, inv_hw):
    # refs = (x_0, ..., x_{K-1}, w1t, w2, attn_out, acc_scratch)
    x_refs = refs[:n_branch]
    w1t_ref = refs[n_branch]
    w2_ref = refs[n_branch + 1]
    attn_ref = refs[n_branch + 2]
    acc_ref = refs[n_branch + 3]

    t = pl.program_id(1)

    @pl.when(t == 0)
    def _init():
        acc_ref[...] = jnp.zeros_like(acc_ref)

    # Branch sum for this spatial tile, accumulated lane-wide (pure VPU adds;
    # the cross-lane reduce is deferred to the finalize step).
    s = x_refs[0][0].astype(jnp.float32)                       # (C, T)
    for k in range(1, n_branch):
        s = s + x_refs[k][0].astype(jnp.float32)
    acc_ref[...] += s                                          # (C, T)

    @pl.when(t == pl.num_programs(1) - 1)
    def _finalize():
        # Global average pool (single lane reduce; padded lanes are zero).
        gap = jnp.sum(acc_ref[...], axis=-1, keepdims=True) * inv_hw   # (C, 1)
        # mlp[0]: 1x1 conv C->d (no bias) + ReLU, as broadcast-mul + sublane reduce.
        h = jnp.sum(w1t_ref[...] * gap, axis=0, keepdims=True)         # (1, d)
        h = jnp.maximum(h, 0.0)
        # mlp[2]: 1x1 conv d->K*C (no bias), as broadcast-mul + lane reduce.
        a = jnp.sum(w2_ref[...] * h, axis=1, keepdims=True)            # (K*C, 1)
        # softmax over the K branches, per channel.
        parts = [a[k * c:(k + 1) * c, :] for k in range(n_branch)]
        m = parts[0]
        for p in parts[1:]:
            m = jnp.maximum(m, p)
        es = [jnp.exp(p - m) for p in parts]
        den = es[0]
        for e in es[1:]:
            den = den + e
        inv_den = 1.0 / den
        for k in range(n_branch):
            attn_ref[0, k] = es[k] * inv_den                    # (C, 1) per branch


# ------------------------- kernel 2: weighted branch sum ----------------------

def _sk_combine_kernel(*refs, n_branch):
    # refs = (attn, x_0, ..., x_{K-1}, out)
    attn_ref = refs[0]
    x_refs = refs[1:1 + n_branch]
    o_ref = refs[1 + n_branch]

    x_dt = jnp.dtype(x_refs[0].dtype)
    # bf16 inputs: multiply-accumulate in bf16 (v6e/v7x VPU) to halve vreg /
    # VMEM traffic; anything else computes in f32.
    compute_dt = x_dt if x_dt in (jnp.dtype(jnp.float32),
                                  jnp.dtype(jnp.bfloat16)) else jnp.dtype(jnp.float32)

    acc = attn_ref[0, 0].astype(compute_dt) * x_refs[0][0].astype(compute_dt)
    for k in range(1, n_branch):
        acc = acc + attn_ref[0, k].astype(compute_dt) * x_refs[k][0].astype(compute_dt)
    o_ref[0] = acc.astype(o_ref.dtype)


# --------------------------------- forward ------------------------------------

def sk_fusion_forward(in_feats, w1, w2):
    """SKFusion.forward.

    in_feats: list/tuple of `height` NCHW arrays, each (B, C, H, W).
    w1: (d, C)        -- mlp[0] = Conv2d(dim, d, 1, bias=False) weight (squeezed).
    w2: (height*C, d) -- mlp[2] = Conv2d(d, dim*height, 1, bias=False) weight.
    """
    K = len(in_feats)
    B, C, H, W = in_feats[0].shape
    HW = H * W
    d = w1.shape[0]
    dtype = in_feats[0].dtype
    itemsize = jnp.dtype(dtype).itemsize

    # Free reshape (B,C,H,W)->(B,C,HW); zero-pad lanes only if HW % 128 != 0.
    hw_pad = ((HW + 127) // 128) * 128
    xs = [f.reshape(B, C, HW) for f in in_feats]
    if hw_pad != HW:
        xs = [jnp.pad(xb, ((0, 0), (0, 0), (0, hw_pad - HW))) for xb in xs]

    vmem_limit, budget = _vmem_limits()
    t_hw = _pick_spatial_tile(hw_pad, K + 1, C, itemsize, budget)
    n_t = hw_pad // t_hw

    x_spec = pl.BlockSpec((1, C, t_hw), lambda b, t: (b, 0, t))

    # Pass 1: GAP of the branch sum + MLP + softmax -> per-branch channel attn.
    # TODO(synk): on v7x with B==1 this reduction pass runs on one TensorCore;
    # a channel-block parallel axis + partial-accumulator epilogue would use both.
    attn = pl.pallas_call(
        functools.partial(_sk_attn_kernel, n_branch=K, c=C, inv_hw=1.0 / HW),
        out_shape=jax.ShapeDtypeStruct((B, K, C, 1), jnp.float32),
        grid=(B, n_t),
        in_specs=[x_spec] * K + [
            pl.BlockSpec((C, d), lambda b, t: (0, 0)),
            pl.BlockSpec((K * C, d), lambda b, t: (0, 0)),
        ],
        out_specs=pl.BlockSpec((1, K, C, 1), lambda b, t: (b, 0, 0, 0)),
        scratch_shapes=[pltpu.VMEM((C, t_hw), jnp.float32)],
        compiler_params=pltpu.CompilerParams(
            dimension_semantics=("parallel", "arbitrary"),
            vmem_limit_bytes=vmem_limit),
    )(*xs, w1.T, w2)

    # Pass 2: out = sum_k attn[k] * x[k], streamed once, fully parallel grid.
    out = pl.pallas_call(
        functools.partial(_sk_combine_kernel, n_branch=K),
        out_shape=jax.ShapeDtypeStruct((B, C, hw_pad), dtype),
        grid=(B, n_t),
        in_specs=[pl.BlockSpec((1, K, C, 1), lambda b, t: (b, 0, 0, 0))] + [x_spec] * K,
        out_specs=pl.BlockSpec((1, C, t_hw), lambda b, t: (b, 0, t)),
        compiler_params=pltpu.CompilerParams(
            dimension_semantics=("parallel", "parallel"),
            vmem_limit_bytes=vmem_limit),
    )(attn, *xs)

    if hw_pad != HW:
        out = out[..., :HW]
    return out.reshape(B, C, H, W)


# ----------------------------- reference / main --------------------------------

def sk_fusion_reference(in_feats, w1, w2):
    # pure-JAX reference mirroring the PyTorch module (for correctness only)
    K = len(in_feats)
    B, C, H, W = in_feats[0].shape
    x = jnp.stack(in_feats, axis=1)                     # (B, K, C, H, W)
    feats_sum = jnp.sum(x, axis=1)                      # (B, C, H, W)
    gap = jnp.mean(feats_sum, axis=(2, 3))              # (B, C)  adaptive avg pool
    h = jnp.maximum(gap @ w1.T, 0.0)                    # (B, d)
    a = (h @ w2.T).reshape(B, K, C)                     # (B, K, C)
    attn = jax.nn.softmax(a, axis=1)                    # softmax over height
    out = jnp.sum(x * attn[..., None, None], axis=1)    # (B, C, H, W)
    return out


if __name__ == "__main__":
    B, C, H, W = 2, 32, 16, 16
    height, reduction = 2, 8
    d = max(C // reduction, 4)

    key = jax.random.PRNGKey(0)
    k1, k2, k3, k4 = jax.random.split(key, 4)
    x0 = jax.random.normal(k1, (B, C, H, W), jnp.float32)
    x1 = jax.random.normal(k2, (B, C, H, W), jnp.float32)
    w1 = 0.2 * jax.random.normal(k3, (d, C), jnp.float32)
    w2 = 0.2 * jax.random.normal(k4, (height * C, d), jnp.float32)

    y = jax.block_until_ready(sk_fusion_forward([x0, x1], w1, w2))
    assert y.shape == (B, C, H, W) and y.dtype == jnp.float32

    y_ref = jax.block_until_ready(sk_fusion_reference([x0, x1], w1, w2))
    max_err = float(jnp.max(jnp.abs(y - y_ref)))
    assert max_err < 1e-3, f"max abs err too large: {max_err}"

    print("KERNEL_OK")
</pallas_src>

<mosaic_0001>
module attributes {stable_mosaic.version = 11 : i64} {
  func.func @_sk_attn_kernel(%arg0: i32, %arg1: i32, %arg2: memref<1x32x256xf32, #tpu.memory_space<vmem>>, %arg3: memref<1x32x256xf32, #tpu.memory_space<vmem>>, %arg4: memref<32x4xf32, #tpu.memory_space<vmem>>, %arg5: memref<64x4xf32, #tpu.memory_space<vmem>>, %arg6: memref<1x2x32x1xf32, #tpu.memory_space<vmem>>, %arg7: memref<32x256xf32, #tpu.memory_space<vmem>>) attributes {dimension_semantics = [#tpu.dimension_semantics<parallel>, #tpu.dimension_semantics<arbitrary>], iteration_bounds = array<i64: 2, 1>, scalar_prefetch = 0 : i64, scratch_operands = 1 : i64, tpu.core_type = #tpu.core_type<tc>, window_params = [{transform_indices = @transform_0, window_bounds = array<i64: 1, 32, 256>}, {transform_indices = @transform_1, window_bounds = array<i64: 1, 32, 256>}, {pipeline_mode = #tpu.pipeline_mode<synchronous>, transform_indices = @transform_2, window_bounds = array<i64: 32, 4>}, {pipeline_mode = #tpu.pipeline_mode<synchronous>, transform_indices = @transform_3, window_bounds = array<i64: 64, 4>}, {transform_indices = @transform_4, window_bounds = array<i64: 1, 2, 32, 1>}]} {
    %c0_i32 = arith.constant 0 : i32
    %0 = arith.cmpi eq, %arg1, %c0_i32 : i32
    %1 = arith.extui %0 : i1 to i32
    %c0_i32_0 = arith.constant 0 : i32
    %2 = arith.cmpi ne, %1, %c0_i32_0 : i32
    scf.if %2 {
      %cst = arith.constant 0.000000e+00 : f32
      %14 = vector.broadcast %cst : f32 to vector<32x256xf32>
      %c0_12 = arith.constant 0 : index
      %c0_13 = arith.constant 0 : index
      %15 = vector.load %arg7[%c0_12, %c0_13] : memref<32x256xf32, #tpu.memory_space<vmem>>, vector<32x256xf32>
      tpu.vector_store %arg7[%c0_12, %c0_13], %14 {strides = array<i32>} : memref<32x256xf32, #tpu.memory_space<vmem>>, vector<32x256xf32>,
    } else {
    }
    %c0 = arith.constant 0 : index
    %c0_1 = arith.constant 0 : index
    %c0_2 = arith.constant 0 : index
    %3 = vector.load %arg2[%c0, %c0_1, %c0_2] : memref<1x32x256xf32, #tpu.memory_space<vmem>>, vector<1x32x256xf32>
    %4 = vector.shape_cast %3 : vector<1x32x256xf32> to vector<32x256xf32>
    %c0_3 = arith.constant 0 : index
    %c0_4 = arith.constant 0 : index
    %c0_5 = arith.constant 0 : index
    %5 = vector.load %arg3[%c0_3, %c0_4, %c0_5] : memref<1x32x256xf32, #tpu.memory_space<vmem>>, vector<1x32x256xf32>
    %6 = vector.shape_cast %5 : vector<1x32x256xf32> to vector<32x256xf32>
    %7 = arith.addf %4, %6 : vector<32x256xf32>
    %c0_6 = arith.constant 0 : index
    %c0_7 = arith.constant 0 : index
    %8 = vector.load %arg7[%c0_6, %c0_7] : memref<32x256xf32, #tpu.memory_space<vmem>>, vector<32x256xf32>
    %9 = arith.addf %8, %7 : vector<32x256xf32>
    %c0_8 = arith.constant 0 : index
    %c0_9 = arith.constant 0 : index
    %10 = vector.load %arg7[%c0_8, %c0_9] : memref<32x256xf32, #tpu.memory_space<vmem>>, vector<32x256xf32>
    tpu.vector_store %arg7[%c0_8, %c0_9], %9 {strides = array<i32>} : memref<32x256xf32, #tpu.memory_space<vmem>>, vector<32x256xf32>,
    %c0_i32_10 = arith.constant 0 : i32
    %11 = arith.cmpi eq, %arg1, %c0_i32_10 : i32
    %12 = arith.extui %11 : i1 to i32
    %c0_i32_11 = arith.constant 0 : i32
    %13 = arith.cmpi ne, %12, %c0_i32_11 : i32
    scf.if %13 {
      %c0_12 = arith.constant 0 : index
      %c0_13 = arith.constant 0 : index
      %14 = vector.load %arg7[%c0_12, %c0_13] : memref<32x256xf32, #tpu.memory_space<vmem>>, vector<32x256xf32>
      %cst = arith.constant dense<0.000000e+00> : vector<32xf32>
      %15 = vector.multi_reduction <add>, %14, %cst [1] : vector<32x256xf32> to vector<32xf32>
      %16 = vector.shape_cast %15 : vector<32xf32> to vector<32x1xf32>
      %cst_14 = arith.constant 3.906250e-03 : f32
      %17 = vector.broadcast %cst_14 : f32 to vector<32x1xf32>
      %18 = arith.mulf %16, %17 : vector<32x1xf32>
      %c0_15 = arith.constant 0 : index
      %c0_16 = arith.constant 0 : index
      %19 = vector.load %arg4[%c0_15, %c0_16] : memref<32x4xf32, #tpu.memory_space<vmem>>, vector<32x4xf32>
      %20 = vector.broadcast %18 : vector<32x1xf32> to vector<32x4xf32>
      %21 = arith.mulf %19, %20 : vector<32x4xf32>
      %cst_17 = arith.constant dense<0.000000e+00> : vector<4xf32>
      %22 = vector.multi_reduction <add>, %21, %cst_17 [0] : vector<32x4xf32> to vector<4xf32>
      %23 = vector.shape_cast %22 : vector<4xf32> to vector<1x4xf32>
      %cst_18 = arith.constant 0.000000e+00 : f32
      %24 = vector.broadcast %cst_18 : f32 to vector<1x4xf32>
      %25 = arith.maximumf %23, %24 : vector<1x4xf32>
      %c0_19 = arith.constant 0 : index
      %c0_20 = arith.constant 0 : index
      %26 = vector.load %arg5[%c0_19, %c0_20] : memref<64x4xf32, #tpu.memory_space<vmem>>, vector<64x4xf32>
      %27 = vector.broadcast %25 : vector<1x4xf32> to vector<64x4xf32>
      %28 = arith.mulf %26, %27 : vector<64x4xf32>
      %cst_21 = arith.constant dense<0.000000e+00> : vector<64xf32>
      %29 = vector.multi_reduction <add>, %28, %cst_21 [1] : vector<64x4xf32> to vector<64xf32>
      %30 = vector.shape_cast %29 : vector<64xf32> to vector<64x1xf32>
      %31 = vector.extract_strided_slice %30 {offsets = [0, 0], sizes = [32, 1], strides = [1, 1]} : vector<64x1xf32> to vector<32x1xf32>
      %32 = vector.extract_strided_slice %30 {offsets = [32, 0], sizes = [32, 1], strides = [1, 1]} : vector<64x1xf32> to vector<32x1xf32>
      %33 = arith.maximumf %31, %32 : vector<32x1xf32>
      %34 = arith.subf %31, %33 : vector<32x1xf32>
      %35 = math.exp %34 : vector<32x1xf32>
      %36 = arith.subf %32, %33 : vector<32x1xf32>
      %37 = math.exp %36 : vector<32x1xf32>
      %38 = arith.addf %35, %37 : vector<32x1xf32>
      %cst_22 = arith.constant 1.000000e+00 : f32
      %39 = vector.broadcast %cst_22 : f32 to vector<32x1xf32>
      %40 = arith.divf %39, %38 : vector<32x1xf32>
      %41 = arith.mulf %35, %40 : vector<32x1xf32>
      %c0_23 = arith.constant 0 : index
      %c0_24 = arith.constant 0 : index
      %c0_25 = arith.constant 0 : index
      %c0_26 = arith.constant 0 : index
      %42 = vector.load %arg6[%c0_23, %c0_24, %c0_25, %c0_26] : memref<1x2x32x1xf32, #tpu.memory_space<vmem>>, vector<1x1x32x1xf32>
      %43 = vector.shape_cast %42 : vector<1x1x32x1xf32> to vector<32x1xf32>
      %44 = vector.shape_cast %41 : vector<32x1xf32> to vector<1x1x32x1xf32>
      tpu.vector_store %arg6[%c0_23, %c0_24, %c0_25, %c0_26], %44 {strides = array<i32>} : memref<1x2x32x1xf32, #tpu.memory_space<vmem>>, vector<1x1x32x1xf32>,
      %45 = arith.mulf %37, %40 : vector<32x1xf32>
      %c0_27 = arith.constant 0 : index
      %c1 = arith.constant 1 : index
      %c0_28 = arith.constant 0 : index
      %c0_29 = arith.constant 0 : index
      %46 = vector.load %arg6[%c0_27, %c1, %c0_28, %c0_29] : memref<1x2x32x1xf32, #tpu.memory_space<vmem>>, vector<1x1x32x1xf32>
      %47 = vector.shape_cast %46 : vector<1x1x32x1xf32> to vector<32x1xf32>
      %48 = vector.shape_cast %45 : vector<32x1xf32> to vector<1x1x32x1xf32>
      tpu.vector_store %arg6[%c0_27, %c1, %c0_28, %c0_29], %48 {strides = array<i32>} : memref<1x2x32x1xf32, #tpu.memory_space<vmem>>, vector<1x1x32x1xf32>,
    } else {
    }
    return
  }
  func.func @transform_0(%arg0: i32, %arg1: i32) -> (i32, i32, i32) {
    %c0_i32 = arith.constant 0 : i32
    %c0_i32_0 = arith.constant 0 : i32
    return %arg0, %c0_i32, %arg1 : i32, i32, i32
  }
  func.func @transform_1(%arg0: i32, %arg1: i32) -> (i32, i32, i32) {
    %c0_i32 = arith.constant 0 : i32
    %c0_i32_0 = arith.constant 0 : i32
    return %arg0, %c0_i32, %arg1 : i32, i32, i32
  }
  func.func @transform_2(%arg0: i32, %arg1: i32) -> (i32, i32) {
    %c0_i32 = arith.constant 0 : i32
    %c0_i32_0 = arith.constant 0 : i32
    %c0_i32_1 = arith.constant 0 : i32
    return %c0_i32, %c0_i32_0 : i32, i32
  }
  func.func @transform_3(%arg0: i32, %arg1: i32) -> (i32, i32) {
    %c0_i32 = arith.constant 0 : i32
    %c0_i32_0 = arith.constant 0 : i32
    %c0_i32_1 = arith.constant 0 : i32
    return %c0_i32, %c0_i32_0 : i32, i32
  }
  func.func @transform_4(%arg0: i32, %arg1: i32) -> (i32, i32, i32, i32) {
    %c0_i32 = arith.constant 0 : i32
    %c0_i32_0 = arith.constant 0 : i32
    %c0_i32_1 = arith.constant 0 : i32
    %c0_i32_2 = arith.constant 0 : i32
    return %arg0, %c0_i32, %c0_i32_0, %c0_i32_1 : i32, i32, i32, i32
  }
}

</mosaic_0001>

<bundles_post_ra>
// kernel: tpu_custom_call.1
= control target key start
LH: loop header
LB: loop body
LE: loop exit
PB: predicated region body
PF: predicated region fallthrough
CT: control target
= control target key end

     0   :  { %9 = vsyncpa [#allocation4], 0  ;;  %s1087_s0 = inlined_call_operand.hbm [shape: f32[2,32,256], index: 0, kind: input, shape index: {}]   ;;  %s1088_s1 = inlined_call_operand.hbm [shape: f32[2,32,256], index: 1, kind: input, shape index: {}]   ;;  %s1089_s2 = inlined_call_operand.vmem [shape: f32[32,4], index: 2, kind: input, shape index: {}]   ;;  %s1090_s3 = inlined_call_operand.vmem [shape: f32[64,4], index: 3, kind: input, shape index: {}]   ;;  %s1091_s4 = inlined_call_operand.vmem [shape: f32[2,2,32,1], index: 4, kind: output, shape index: {}]  }
   0x1   :  { %11 = vsyncpa [#allocation4 + $0x1], 0 }
   0x2   :  { %12 = vsyncpa [#allocation6], 0 }
   0x3   :  { %14 = vsyncpa [#allocation6 + $0x1], 0  ;;  %s847_s15 = smov 0   ;;  %s849_s16 = smov 0  }
   0x4   :  { %s851_s17 = smov 0   ;;  %s853_s18 = smov 0  }
   0x5   :  { %s855_s19 = smov 0   ;;  %s857_s20 = smov 0  }
   0x6 LB: > { %s592_s21 = sadd.s32 4294967295, %s816_s20   ;;  %s32_s22 = sadd.s32 1, %s812_s19  ;;  %s816_s20 = sphi %s857_s20, %s20_s20   ;;  %s812_s19 = sphi %s855_s19, %s1102_s19   ;;  %s808_s18 = sphi %s853_s18, %s1101_s18   ;;  %s804_s17 = sphi %s851_s17, %s1100_s17   ;;  %s800_s16 = sphi %s849_s16, %s1099_s16   ;;  %s796_s15 = sphi %s847_s15, %s1098_s15  }
   0x7   : > { %p34_p0 = scmp.ge.s32.totalorder %s32_s22, 2  ;;  %s41_s23 = sadd.s32 1, %s804_s17 }
   0x8   : > { %p48_p1 = scmp.ne.s32.totalorder %s804_s17, %s800_s16  ;;  %p49_p2 = scmp.eq.s32.totalorder %s816_s20, 0 }
   0x9   : > { %s1104_s22 = smov (%p34_p0, %s32_s22), 0  ;;  %p54_p4 = scmp.ne.s32.totalorder %s800_s16, %s796_s15 }
   0xa   : > { %p883_p3 = por %p49_p2, %p48_p1  ;;  %s36_s25 = ssub.s32 %s812_s19, %s1104_s22 }
   0xb   : > { %p55_p5 = scmp.eq.s32.totalorder %s592_s21, 0  ;;  %p39_p6 = scmp.eq.s32.totalorder %s36_s25, 0 }
   0xc   : > { %p627_p8 = scmp.lt.s32.totalorder %s816_s20, 2  ;;  %s899_s28 = sand.u32 1, %s804_s17  }
   0xd   : > { %p890_p7 = por %p55_p5, %p54_p4  ;;  %s613_s29 = sshll.u32 %s812_s19, 10 }
   0xe   : > { %s896_s27 = scalar_select %p39_p6, %s804_s17, %s41_s23  }
   0xf   : > { %s1094_s26 = scalar_select %p890_p7, 1, 0 }
  0x10   : > { %s596_s30 = sshll.u32 %s899_s28, 6  ;;  %s908_s7 = scalar_lea.hbm %s1087_s0, %s613_s29 }
  0x11   : > { %s184_s8 = scalar_lea.vmem [#allocation3], %s596_s30  ;;  %p914_p9 = pnand %p627_p8, %p883_p3 }
  0x12   : > { %s193_s9 = sshll.u32 %s184_s8, 4  ;;  %s181_s11 = scalar_lea.sflag [#allocation4], %s899_s28  ;;  %s918_s9 = int_to_ptr.vmem [resolvable:$true] %s193_s9 }
  0x13   : > { %s702_s12 = scalar_lea.hbm %s908_s7, 1024  ;;  %p704_p11 = pneg %p914_p9 }
  0x14   : > { %p703_p10 = scmp.ne.s32.totalorder %s908_s7, %s702_s12  ;;  %s707_s15 = scalar_lea.hbm %s1087_s0, 2048 }
  0x15   : > { %p708_p0 = scmp.lt.u32.totalorder %s908_s7, %s1087_s0  ;;  %p709_p1 = scmp.lt.u32.totalorder %s707_s15, %s702_s12 }
  0x16   : > { %p705_p12 = pnand %p704_p11, %p703_p10  ;;  %p711_p3 = scmp.lt.u32.totalorder %s702_s12, %s908_s7 }
  0x17   : > { %p710_p2 = por %p709_p1, %p708_p0 }
  0x18   : > { %p706_p13 = pneg %p705_p12 }
  0x19   : > { %p712_p4 = por %p711_p3, %p710_p2 }
  0x1b   : > { %p713_p5 = pnand %p712_p4, %p706_p13 }
  0x1d   : > { %716 = shalt.err (!%p713_p5)
}
  0x1e   : > { %s717_s24 = scalar_lea.vmem %s918_s9, 1024  ;;  %s818_s25 = smov [#allocation3]  }
  0x1f   : > { %p718_p6 = scmp.ne.s32.totalorder %s918_s9, %s717_s24  ;;  %s722_s5 = sshll.u32 %s818_s25, 4  ;;  %s723_s5 = int_to_ptr.vmem [resolvable:$false] %s722_s5 }
  0x20   : > { %s724_s6 = scalar_lea.vmem %s723_s5, 2048  ;;  %p725_p12 = scmp.lt.s32.totalorder %s918_s9, %s723_s5 }
  0x21   : > { %p720_p8 = pnand %p718_p6, %p704_p11  ;;  %p726_p0 = scmp.lt.s32.totalorder %s724_s6, %s717_s24 }
  0x23   : > { %p721_p10 = pneg %p720_p8  ;;  %p727_p1 = por %p726_p0, %p725_p12 }
  0x25   : > { %p728_p2 = pnand %p727_p1, %p721_p10 }
  0x27   : > { %731 = shalt.err (!%p728_p2)
}
  0x28   : > { %s819_s8 = smov 256   ;;  %s820_s12 = smov 16  }
  0x29   : > { %623 = dma.hbm_to_vmem [thread:$0]  (!%p914_p9), %s908_s7, 1024, %s918_s9, %s181_s11, %s819_s8, %s819_s8, %s820_s12  }
  0x2a   : > { %p602_p13 = scmp.ge.s32.totalorder %s816_s20, 1  ;;  %p224_p3 = scmp.lt.s32.totalorder %s816_s20, 3 }
  0x2b   : > { %s962_s21 = scalar_lea.hbm %s1088_s1, %s613_s29  ;;  %s207_s23 = scalar_lea.vmem [#allocation5], %s596_s30 }
  0x2c   : > { %p953_p4 = pnand %p602_p13, %p224_p3  ;;  %s216_s24 = sshll.u32 %s207_s23, 4  ;;  %s966_s24 = int_to_ptr.vmem [resolvable:$true] %s216_s24 }
  0x2d   : > { %s204_s7 = scalar_lea.sflag [#allocation6], %s899_s28  ;;  %s732_s9 = scalar_lea.hbm %s962_s21, 1024 }
  0x2e   : > { %p733_p5 = scmp.ne.s32.totalorder %s962_s21, %s732_s9  ;;  %s737_s29 = scalar_lea.hbm %s1088_s1, 2048 }
  0x2f   : > { %p738_p10 = scmp.lt.u32.totalorder %s962_s21, %s1088_s1  ;;  %p739_p12 = scmp.lt.u32.totalorder %s737_s29, %s732_s9 }
  0x30   : > { %p735_p6 = pnand %p733_p5, %p704_p11  ;;  %p741_p1 = scmp.lt.u32.totalorder %s732_s9, %s962_s21 }
  0x31   : > { %p740_p0 = por %p739_p12, %p738_p10 }
  0x32   : > { %p736_p8 = pneg %p735_p6 }
  0x33   : > { %p742_p2 = por %p741_p1, %p740_p0 }
  0x35   : > { %p743_p13 = pnand %p742_p2, %p736_p8 }
  0x37   : > { %746 = shalt.err (!%p743_p13)
}
  0x38   : > { %s747_s30 = scalar_lea.vmem %s966_s24, 1024  ;;  %s821_s14 = smov [#allocation5]  }
  0x39   : > { %p748_p3 = scmp.ne.s32.totalorder %s966_s24, %s747_s30  ;;  %s752_s15 = sshll.u32 %s821_s14, 4  ;;  %s753_s15 = int_to_ptr.vmem [resolvable:$false] %s752_s15 }
  0x3a   : > { %s754_s23 = scalar_lea.vmem %s753_s15, 2048  ;;  %p755_p7 = scmp.lt.s32.totalorder %s966_s24, %s753_s15 }
  0x3b   : > { %p750_p5 = pnand %p748_p3, %p704_p11  ;;  %p756_p10 = scmp.lt.s32.totalorder %s754_s23, %s747_s30 }
  0x3d   : > { %p751_p6 = pneg %p750_p5  ;;  %p757_p12 = por %p756_p10, %p755_p7 }
  0x3f   : > { %p758_p0 = pnand %p757_p12, %p751_p6 }
  0x41   : > { %761 = shalt.err (!%p758_p0)
}
  0x42   : > { %626 = dma.hbm_to_vmem [thread:$0]  (!%p914_p9), %s962_s21, 1024, %s966_s24, %s204_s7, %s819_s8, %s819_s8, %s820_s12  }
  0x43   : > { %228 = sbr.rel (%p953_p4) target bundleno = 447 (0x1bf), region = 36  ;;  %s230_s9 = sand.u32 (!%p953_p4), 1, %s800_s16  }
  0x44   : > { %s603_s11 = sshll.u32 (!%p953_p4), %s230_s9, 6  ;;  %s231_s25 = scalar_lea.sflag (!%p953_p4), [#allocation4], %s230_s9 }
  0x45   : > { %s234_s29 = scalar_lea.vmem (!%p953_p4), [#allocation3], %s603_s11  ;;  %p1097_p7 = scmp.ne.s32.totalorder (!%p953_p4), %s1094_s26, 0 }
  0x4a   : > { %787 = dma.done.wait (%p1097_p7), %s231_s25, 1024  }
  0x4b   : > { %789 = vsyncadd (%p1097_p7), %s231_s25, 4294966272  ;;  %s240_s10 = scalar_lea.sflag [#allocation6], %s230_s9  ;;  %s243_s28 = scalar_lea.vmem [#allocation5], %s603_s11 }
  0x4c   : > { %791 = dma.done.wait (%p1097_p7), %s240_s10, 1024  }
  0x4d   : > { %793 = vsyncadd (%p1097_p7), %s240_s10, 4294966272  ;;  %v292_v0 = vld [vmem:[%s234_s29] sm:$0xff]  ;;  %v293_v1 = vld [vmem:[%s234_s29 + $0x8] sm:$0xff]  ;;  %vm375_vm0 = vcmask 31744   ;;  %p275_p9 = scmp.lt.s32.totalorder %s808_s18, 1  ;;  %vm474_vm1 = vcmask 7168  }
  0x4e   : > { %v300_v2 = vld [vmem:[%s243_s28] sm:$0xff]  ;;  %v301_v3 = vld [vmem:[%s243_s28 + $0x8] sm:$0xff]  ;;  %v294_v10 = vld [vmem:[%s234_s29 + $0x10] sm:$0xff] }
  0x4f   : > { %v308_v4 = vadd.f32 %v300_v2, %v292_v0  ;;  %v296_v5 = vld [vmem:[%s234_s29 + $0x20] sm:$0xff]  ;;  %v297_v6 = vld [vmem:[%s234_s29 + $0x28] sm:$0xff]  ;;  %v309_v7 = vadd.f32 %v301_v3, %v293_v1  ;;  %v295_v13 = vld [vmem:[%s234_s29 + $0x18] sm:$0xff]  ;;  %s1106_s18 = smov (!%p275_p9, %s808_s18), 1 }
  0x50   : > { %v304_v8 = vld [vmem:[%s243_s28 + $0x20] sm:$0xff]  ;;  %v305_v9 = vld [vmem:[%s243_s28 + $0x28] sm:$0xff]  ;;  %v302_v14 = vld [vmem:[%s243_s28 + $0x10] sm:$0xff]  ;;  %s615_s24 = sshll.u32 %s1106_s18, 6 }
  0x51   : > { %v312_v11 = vadd.f32 %v304_v8, %v296_v5  ;;  %v313_v12 = vadd.f32 %v305_v9, %v297_v6  ;;  %v303_v15 = vld [vmem:[%s243_s28 + $0x18] sm:$0xff]  ;;  %v351_v16 = vadd.f32 %v309_v7, %v308_v4  ;;  %v310_v17 = vadd.f32 %v302_v14, %v294_v10  ;;  %v298_v19 = vld [vmem:[%s234_s29 + $0x30] sm:$0xff]  ;;  %v367_v31 = vld [vmem:[%s1089_s2] sm:$0xff]  ;;  %s279_s6 = scalar_lea.vmem %s1091_s4, %s615_s24 }
  0x52   : > { %v311_v18 = vadd.f32 %v303_v15, %v295_v13  ;;  %v299_v20 = vld [vmem:[%s234_s29 + $0x38] sm:$0xff]  ;;  %v306_v21 = vld [vmem:[%s243_s28 + $0x30] sm:$0xff]  ;;  %v368_v34 = vld [vmem:[%s1089_s2 + $0x8] sm:$0xff] }
  0x53   : > { %v357_v22 = vadd.f32 %v313_v12, %v312_v11  ;;  %v307_v23 = vld [vmem:[%s243_s28 + $0x38] sm:$0xff]  ;;  %v314_v24 = vadd.f32 %v306_v21, %v298_v19  ;;  %352 = vadd.xlane.f32.xlu0 %v351_v16  ;;  %v369_v33 = vld [vmem:[%s1089_s2 + $0x10] sm:$0xff]  ;;  %v391_v57 = vld [vmem:[%s1090_s3 + $0x8] sm:$0xff] }
  0x54   : > { %v354_v25 = vadd.f32 %v311_v18, %v310_v17  ;;  %v315_v26 = vadd.f32 %v307_v23, %v299_v20  ;;  %v370_v38 = vld [vmem:[%s1089_s2 + $0x18] sm:$0xff]  ;;  %v390_v58 = vld [vmem:[%s1090_s3] sm:$0xff]  ;;  %v392_v61 = vld [vmem:[%s1090_s3 + $0x10] sm:$0xff] }
  0x55   : > { %358 = vadd.xlane.f32.xlu1 %v357_v22  ;;  %v393_v60 = vld [vmem:[%s1090_s3 + $0x18] sm:$0xff]  ;;  %v395_v4 = vld [vmem:[%s1090_s3 + $0x28] sm:$0xff]  ;;  %v394_v5 = vld [vmem:[%s1090_s3 + $0x20] sm:$0xff] }
  0x56   : > { %v360_v27 = vadd.f32 %v315_v26, %v314_v24  ;;  %v397_v10 = vld [vmem:[%s1090_s3 + $0x38] sm:$0xff]  ;;  %v396_v11 = vld [vmem:[%s1090_s3 + $0x30] sm:$0xff] }
  0x57   : > { %355 = vadd.xlane.f32.xlu0 %v354_v25 }
  0x59   : > { %361 = vadd.xlane.f32.xlu1 %v360_v27 }
  0xe0   : > { %v353_v28 = vpop.xlane.xlu0 %352 }
  0xe1   : > { %v363_v29 = vmul.f32 0.00390625, %v353_v28 }
  0xe2   : > { %v359_v30 = vpop.xlane.xlu1 %358 }
  0xe3   : > { %v365_v32 = vmul.f32 0.00390625, %v359_v30  ;;  %v371_v36 = vmul.f32 %v367_v31, %v363_v29 }
  0xe4   : > { %v356_v35 = vpop.xlane.xlu0 %355 }
  0xe5   : > { %v364_v37 = vmul.f32 0.00390625, %v356_v35  ;;  %v373_v41 = vmul.f32 %v369_v33, %v365_v32  ;;  %v376_v44 = vsel %vm375_vm0, %v371_v36, 0.0 }
  0xe6   : > { %v362_v39 = vpop.xlane.xlu1 %361 }
  0xe7   : > { %v366_v40 = vmul.f32 0.00390625, %v362_v39  ;;  %v372_v42 = vmul.f32 %v368_v34, %v364_v37  ;;  %v379_v47 = vsel %vm375_vm0, %v373_v41, 0.0 }
  0xe9   : > { %v374_v43 = vmul.f32 %v370_v38, %v366_v40  ;;  %v377_v45 = vsel %vm375_vm0, %v372_v42, 0.0 }
  0xea   : > { %v378_v46 = vadd.f32 %v377_v45, %v376_v44 }
  0xeb   : > { %v381_v48 = vsel %vm375_vm0, %v374_v43, 0.0 }
  0xec   : > { %v380_v49 = vadd.f32 %v379_v47, %v378_v46 }
  0xee   : > { %v382_v50 = vadd.f32 %v381_v48, %v380_v49 }
  0xf0   : > { %v383_v51 = vrot.slane %v382_v50, 4 }
  0xf2   : > { %v384_v52 = vadd.f32 %v383_v51, %v382_v50 }
  0xf4   : > { %v385_v53 = vrot.slane %v384_v52, 2 }
  0xf6   : > { %v386_v54 = vadd.f32 %v385_v53, %v384_v52 }
  0xf8   : > { %v387_v55 = vrot.slane %v386_v54, 1 }
  0xfa   : > { %v388_v56 = vadd.f32 %v387_v55, %v386_v54 }
  0xfc   : > { %v389_v59 = vmax.f32 %v388_v56, 0.0 }
  0xfe   : > { %v399_v62 = vmul.f32 %v391_v57, %v389_v59  ;;  %v398_v63 = vmul.f32 %v390_v58, %v389_v59  ;;  %v401_v2 = vmul.f32 %v393_v60, %v389_v59  ;;  %v400_v3 = vmul.f32 %v392_v61, %v389_v59 }
  0xff   : > { %v403_v8 = vmul.f32 %v395_v4, %v389_v59  ;;  %v402_v9 = vmul.f32 %v394_v5, %v389_v59  ;;  %v405_v14 = vmul.f32 %v397_v10, %v389_v59  ;;  %v404_v15 = vmul.f32 %v396_v11, %v389_v59 }
 0x100   : > { %v409_v0 = vsel %vm375_vm0, %v399_v62, 0.0  ;;  %v406_v1 = vsel %vm375_vm0, %v398_v63, 0.0  ;;  %v415_v6 = vsel %vm375_vm0, %v401_v2, 0.0  ;;  %v412_v7 = vsel %vm375_vm0, %v400_v3, 0.0 }
 0x101   : > { %410 = vadd.xlane.f32.xlu1 %v409_v0  ;;  %407 = vadd.xlane.f32.xlu0 %v406_v1  ;;  %v421_v12 = vsel %vm375_vm0, %v403_v8, 0.0  ;;  %v418_v13 = vsel %vm375_vm0, %v402_v9, 0.0  ;;  %v427_v16 = vsel %vm375_vm0, %v405_v14, 0.0  ;;  %v424_v17 = vsel %vm375_vm0, %v404_v15, 0.0 }
 0x105   : > { %416 = vadd.xlane.f32.xlu1 %v415_v6  ;;  %413 = vadd.xlane.f32.xlu0 %v412_v7 }
 0x109   : > { %422 = vadd.xlane.f32.xlu1 %v421_v12  ;;  %419 = vadd.xlane.f32.xlu0 %v418_v13 }
 0x10d   : > { %428 = vadd.xlane.f32.xlu1 %v427_v16  ;;  %425 = vadd.xlane.f32.xlu0 %v424_v17 }
 0x18e   : > { %v411_v18 = vpop.xlane.xlu1 %410  ;;  %v408_v19 = vpop.xlane.xlu0 %407 }
 0x192   : > { %v417_v20 = vpop.xlane.xlu1 %416  ;;  %v414_v21 = vpop.xlane.xlu0 %413 }
 0x196   : > { %v423_v22 = vpop.xlane.xlu1 %422  ;;  %v420_v23 = vpop.xlane.xlu0 %419 }
 0x197   : > { %v431_v24 = vmax.f32 %v411_v18, %v423_v22  ;;  %v430_v25 = vmax.f32 %v408_v19, %v420_v23 }
 0x199   : > { %v435_v26 = vsub.f32 %v411_v18, %v431_v24  ;;  %v447_v27 = vsub.f32 %v423_v22, %v431_v24  ;;  %v434_v28 = vsub.f32 %v408_v19, %v430_v25  ;;  %v446_v29 = vsub.f32 %v420_v23, %v430_v25 }
 0x19a   : > { %v429_v30 = vpop.xlane.xlu1 %428  ;;  %v426_v31 = vpop.xlane.xlu0 %425 }
 0x19b   : > { %v440_v32 = vmul.f32 1.442695, %v435_v26  ;;  %v452_v33 = vmul.f32 1.442695, %v447_v27  ;;  %v438_v34 = vmul.f32 1.442695, %v434_v28  ;;  %v433_v35 = vmax.f32 %v417_v20, %v429_v30 }
 0x19c   : > { %v450_v36 = vmul.f32 1.442695, %v446_v29  ;;  %v432_v37 = vmax.f32 %v414_v21, %v426_v31 }
 0x19d   : > { %678 = vpow2.f32 %v440_v32  ;;  %v437_v38 = vsub.f32 %v417_v20, %v433_v35  ;;  %v449_v39 = vsub.f32 %v429_v30, %v433_v35 }
 0x19e   : > { %680 = vpow2.f32 %v452_v33  ;;  %v436_v40 = vsub.f32 %v414_v21, %v432_v37  ;;  %v448_v41 = vsub.f32 %v426_v31, %v432_v37 }
 0x19f   : > { %682 = vpow2.f32 %v438_v34  ;;  %v444_v42 = vmul.f32 1.442695, %v437_v38  ;;  %v456_v43 = vmul.f32 1.442695, %v449_v39 }
 0x1a0   : > { %684 = vpow2.f32 %v450_v36  ;;  %v442_v44 = vmul.f32 1.442695, %v436_v40  ;;  %v454_v45 = vmul.f32 1.442695, %v448_v41 }
 0x1a1   : > { %686 = vpow2.f32 %v444_v42 }
 0x1a2   : > { %688 = vpow2.f32 %v456_v43 }
 0x1a3   : > { %690 = vpow2.f32 %v442_v44 }
 0x1a4   : > { %692 = vpow2.f32 %v454_v45 }
 0x1a7   : > { %v679_v46 = vpop.eup %678 }
 0x1a8   : > { %v681_v47 = vpop.eup %680 }
 0x1a9   : > { %v683_v48 = vpop.eup %682  ;;  %v459_v49 = vadd.f32 %v681_v47, %v679_v46 }
 0x1aa   : > { %v685_v50 = vpop.eup %684 }
 0x1ab   : > { %v687_v51 = vpop.eup %686  ;;  %694 = vrcp.f32 %v459_v49  ;;  %v458_v52 = vadd.f32 %v685_v50, %v683_v48 }
 0x1ac   : > { %v689_v53 = vpop.eup %688 }
 0x1ad   : > { %v691_v54 = vpop.eup %690  ;;  %696 = vrcp.f32 %v458_v52  ;;  %v461_v55 = vadd.f32 %v689_v53, %v687_v51 }
 0x1ae   : > { %v693_v56 = vpop.eup %692 }
 0x1af   : > { %698 = vrcp.f32 %v461_v55  ;;  %v460_v57 = vadd.f32 %v693_v56, %v691_v54 }
 0x1b1   : > { %700 = vrcp.f32 %v460_v57 }
 0x1b5   : > { %v695_v58 = vpop.eup %694 }
 0x1b6   : > { %v471_v59 = vmul.f32 %v695_v58, %v679_v46  ;;  %v480_v60 = vmul.f32 %v695_v58, %v681_v47 }
 0x1b7   : > { %v697_v61 = vpop.eup %696 }
 0x1b8   : > { %476 = vst.msk [vmem:[%s279_s6 + $0x8] sm:$0xff] %vm474_vm1, %v471_v59  ;;  %608 = vst.msk [vmem:[%s279_s6 + $0x28] sm:$0xff] %vm474_vm1, %v480_v60  ;;  %v470_v62 = vmul.f32 %v697_v61, %v683_v48  ;;  %v479_v63 = vmul.f32 %v697_v61, %v685_v50 }
 0x1b9   : > { %v699_v0 = vpop.eup %698 }
 0x1ba   : > { %475 = vst.msk [vmem:[%s279_s6] sm:$0xff] %vm474_vm1, %v470_v62  ;;  %607 = vst.msk [vmem:[%s279_s6 + $0x20] sm:$0xff] %vm474_vm1, %v479_v63  ;;  %v473_v1 = vmul.f32 %v699_v0, %v687_v51  ;;  %v482_v2 = vmul.f32 %v699_v0, %v689_v53 }
 0x1bb   : > { %v701_v3 = vpop.eup %700 }
 0x1bc   : > { %478 = vst.msk [vmem:[%s279_s6 + $0x18] sm:$0xff] %vm474_vm1, %v473_v1  ;;  %610 = vst.msk [vmem:[%s279_s6 + $0x38] sm:$0xff] %vm474_vm1, %v482_v2  ;;  %v472_v4 = vmul.f32 %v701_v3, %v691_v54  ;;  %v481_v5 = vmul.f32 %v701_v3, %v693_v56 }
 0x1be   : > { %477 = vst.msk [vmem:[%s279_s6 + $0x10] sm:$0xff] %vm474_vm1, %v472_v4  ;;  %609 = vst.msk [vmem:[%s279_s6 + $0x30] sm:$0xff] %vm474_vm1, %v481_v5 }
 0x1bf PF: > { %s20_s20 = sadd.s32 1, %s816_s20   ;;  %s1098_s15 = smov %s800_s16 }
 0x1c0   : > { %p17_p11 = scmp.ge.s32.totalorder %s20_s20, 4   ;;  %s1099_s16 = smov %s804_s17 }
 0x1c1   : > { %s1100_s17 = smov %s896_s27  ;;  %s1101_s18 = smov %s812_s19 }
 0x1c2   : > { %s1102_s19 = smov %s1104_s22  ;;  %19 = sbr.rel (!%p17_p11) target bundleno = 6 (0x6), region = 98 }
 0x1c9   :  { %509 = vsyncpa [#allocation4], 1 }
 0x1ca   :  { %511 = vsyncpa [#allocation4 + $0x1], 1 }
 0x1cb   :  { %512 = vsyncpa [#allocation6], 1 }
 0x1cc   :  { %514 = vsyncpa [#allocation6 + $0x1], 1 }

</bundles_post_ra>
